<compile_context>
chip_gen: v6e
topology: v6e:2x2x1
jax: 0.10.0
libtpu: 0.0.40
codegen_flags: <defaults>
</compile_context>

<pallas_src>
import functools
import math

import jax
import jax.numpy as jnp
import numpy as np
from jax.experimental import pallas as pl
from jax.experimental.pallas import tpu as pltpu  # noqa: F401  (kept for TPU-specific extensions)

# ----------------------------- small config ---------------------------------
BATCH = 2
SEQ = 8
HIDDEN = 32
INTERMEDIATE = 64
NUM_HEADS = 4
NUM_KV_HEADS = 2   # NOTE: the reference module calls repeat_kv(k, num_key_value_heads),
                   # so shapes only work when num_kv_heads**2 == num_heads.
HEAD_DIM = 16
RMS_EPS = 1e-6
ROPE_THETA = 10000.0

assert NUM_KV_HEADS * NUM_KV_HEADS == NUM_HEADS
assert HIDDEN % NUM_HEADS == 0


# ------------------------------- fused kernel --------------------------------
def gemma_layer_kernel(x_ref, mask_ref, cs_ref, ln_ref, wqkv_ref, wod_ref, wgu_ref,
                       o_ref, *, num_heads, num_kv_heads, head_dim,
                       batch, seq, hidden, intermediate, eps):
    H, KV, hd = num_heads, num_kv_heads, head_dim
    B, S, D, I = batch, seq, hidden, intermediate
    n_rep = KV                     # faithful to reference: repeat_kv(k, num_key_value_heads)
    q_w, kv_w = H * hd, KV * hd
    # Column layout of the fused (rot-folded) QKV weight: [q | k | v | q@R | k@R]
    q_off = 0
    k_off = q_w
    v_off = q_w + kv_w
    qr_off = q_w + 2 * kv_w
    kr_off = qr_off + q_w

    x = x_ref[...].astype(jnp.float32)                        # (B*S, D)
    lnw = ln_ref[...].astype(jnp.float32)                     # (2, D)

    def rmsnorm(t, w_row):                                    # w_row: (1, D)
        var = jnp.mean(t * t, axis=-1, keepdims=True)
        return t * jax.lax.rsqrt(var + eps) * (1.0 + w_row)

    # ------------------------------ attention --------------------------------
    xn = rmsnorm(x, lnw[0:1, :])                              # (B*S, D)

    # One fused QKV(+rotated) projection: a single (B*S, D) @ (D, 224) matmul.
    qkv = jnp.dot(xn, wqkv_ref[...], preferred_element_type=jnp.float32)   # (B*S, 224)

    cs = cs_ref[...].astype(jnp.float32)                      # (B*S, 2*hd)
    cos, sin = cs[:, :hd], cs[:, hd:]                         # (B*S, hd) each

    mask = mask_ref[...].astype(jnp.float32)                  # (B, S, S), added directly
    wod = wod_ref[...].astype(jnp.float32)                    # (H*hd, 2*D) packed [wo | wd]
    wo_w, wd_w = wod[:, :D], wod[:, D:]

    scale = 1.0 / math.sqrt(hd)
    h1 = x                                                    # residual accumulator (B*S, D)

    for g in range(KV):                                       # loop KV groups, reuse K/V slices
        k_g = (qkv[:, k_off + g * hd: k_off + (g + 1) * hd] * cos
               + qkv[:, kr_off + g * hd: kr_off + (g + 1) * hd] * sin).reshape(B, S, hd)
        v_g = qkv[:, v_off + g * hd: v_off + (g + 1) * hd].reshape(B, S, hd)
        for r in range(n_rep):
            h = g * n_rep + r                                 # query head index
            q_h = (qkv[:, q_off + h * hd: q_off + (h + 1) * hd] * cos
                   + qkv[:, qr_off + h * hd: qr_off + (h + 1) * hd] * sin).reshape(B, S, hd)
            s = jnp.einsum('bqd,bkd->bqk', q_h, k_g,
                           preferred_element_type=jnp.float32) * scale + mask
            s = s - jnp.max(s, axis=-1, keepdims=True)
            p = jnp.exp(s)
            p = p / jnp.sum(p, axis=-1, keepdims=True)        # exact divide (f32 softmax)
            # TODO(synk): attention dropout is a no-op here (p=0.0, eval mode).
            o_h = jnp.einsum('bqk,bkd->bqd', p, v_g,
                             preferred_element_type=jnp.float32)          # (B, S, hd)
            # Per-head O-projection accumulation: attn_flat never materialized.
            h1 = h1 + jnp.dot(o_h.reshape(B * S, hd),
                              wo_w[h * hd:(h + 1) * hd, :],
                              preferred_element_type=jnp.float32)

    # -------------------------------- MLP ------------------------------------
    h1n = rmsnorm(h1, lnw[1:2, :])
    gu = jnp.dot(h1n, wgu_ref[...], preferred_element_type=jnp.float32)    # (B*S, 2*I)
    gate = jax.nn.gelu(gu[:, :I], approximate=True)           # tanh approximation
    h2 = gate * gu[:, I:]
    out = jnp.dot(h2, wd_w, preferred_element_type=jnp.float32) + h1

    o_ref[...] = out.astype(o_ref.dtype)                      # single lane-dense store


# ------------------------------ wrapper --------------------------------------
def rope_cos_sin(position_ids, head_dim, theta):
    inv_freq = 1.0 / (theta ** (jnp.arange(0, head_dim, 2, dtype=jnp.float32)
                                / head_dim))
    freqs = position_ids.astype(jnp.float32)[..., None] * inv_freq[None, None, :]
    emb = jnp.concatenate([freqs, freqs], axis=-1)             # (B, S, hd)
    return jnp.cos(emb), jnp.sin(emb)


def _rotate_half_matrix(head_dim):
    # rotate_half(t) == t @ rot  (signed permutation).
    half = head_dim // 2
    rot = np.zeros((head_dim, head_dim), np.float32)
    rot[np.arange(half) + half, np.arange(half)] = -1.0        # cols <  half: -t[col+half]
    rot[np.arange(half), np.arange(half) + half] = 1.0         # cols >= half:  t[col-half]
    return rot


def gemma_decoder_layer(hidden_states, attention_mask, position_ids, params):
    # kv_cache=None path of the reference module (prefill, no cache update).
    B, S, D = hidden_states.shape
    hd = HEAD_DIM

    cos, sin = rope_cos_sin(position_ids, hd, ROPE_THETA)      # (B, S, hd)
    cos_sin = jnp.concatenate(
        [cos.reshape(B * S, hd), sin.reshape(B * S, hd)], axis=-1)          # (B*S, 2*hd)

    rot = _rotate_half_matrix(hd)
    rot_q = jnp.asarray(np.kron(np.eye(NUM_HEADS, dtype=np.float32), rot))      # (H*hd, H*hd)
    rot_k = jnp.asarray(np.kron(np.eye(NUM_KV_HEADS, dtype=np.float32), rot))   # (KV*hd, KV*hd)

    # Fused, rot-folded QKV weight: [Wq | Wk | Wv | Wq@R | Wk@R]  -> (D, 224)
    w_qkv_ext = jnp.concatenate(
        [params["wq"], params["wk"], params["wv"],
         params["wq"] @ rot_q, params["wk"] @ rot_k], axis=1)
    w_gu = jnp.concatenate([params["wg"], params["wu"]], axis=1)            # (D, 2*I)
    w_od = jnp.concatenate([params["wo"], params["wd"]], axis=1)            # (H*hd, 2*D)
    ln_packed = jnp.stack([params["input_ln"], params["post_ln"]], axis=0)  # (2, D)
    # TODO(synk): cast weight slabs to bf16 (keep f32 accumulation) when scaling up.

    kernel = functools.partial(
        gemma_layer_kernel, num_heads=NUM_HEADS, num_kv_heads=NUM_KV_HEADS,
        head_dim=hd, batch=B, seq=S, hidden=D, intermediate=INTERMEDIATE,
        eps=RMS_EPS)

    out = pl.pallas_call(
        kernel,
        out_shape=jax.ShapeDtypeStruct((B * S, D), hidden_states.dtype),
    )(hidden_states.reshape(B * S, D), attention_mask, cos_sin, ln_packed,
      w_qkv_ext, w_od, w_gu)
    return out.reshape(B, S, D)


# --------------------------- pure-JAX reference ------------------------------
def reference_layer(x, mask, position_ids, p):
    def rms(h, w):
        hf = h.astype(jnp.float32)
        var = jnp.mean(hf * hf, axis=-1, keepdims=True)
        out = hf * jax.lax.rsqrt(var + RMS_EPS) * (1.0 + w.astype(jnp.float32))
        return out.astype(h.dtype)

    B, S, D = x.shape
    hd, half = HEAD_DIM, HEAD_DIM // 2
    residual = x
    h = rms(x, p["input_ln"])
    q = (h @ p["wq"]).reshape(B, S, NUM_HEADS, hd).transpose(0, 2, 1, 3)
    k = (h @ p["wk"]).reshape(B, S, NUM_KV_HEADS, hd).transpose(0, 2, 1, 3)
    v = (h @ p["wv"]).reshape(B, S, NUM_KV_HEADS, hd).transpose(0, 2, 1, 3)
    cos, sin = rope_cos_sin(position_ids, hd, ROPE_THETA)
    c, s = cos[:, None, :, :], sin[:, None, :, :]

    def rot_half(t):
        return jnp.concatenate([-t[..., half:], t[..., :half]], axis=-1)

    q = q * c + rot_half(q) * s
    k = k * c + rot_half(k) * s
    n_rep = NUM_KV_HEADS
    k = jnp.repeat(k, n_rep, axis=1)
    v = jnp.repeat(v, n_rep, axis=1)
    attn = jnp.einsum('bnqd,bnkd->bnqk', q, k) / math.sqrt(hd)
    attn = attn + mask[:, None, :, :]
    attn = jax.nn.softmax(attn.astype(jnp.float32), axis=-1).astype(q.dtype)
    out = jnp.einsum('bnqk,bnkd->bnqd', attn, v)
    out = out.transpose(0, 2, 1, 3).reshape(B, S, NUM_HEADS * hd) @ p["wo"]
    h = out + residual
    residual = h
    h2 = rms(h, p["post_ln"])
    gate = jax.nn.gelu(h2 @ p["wg"], approximate=True)
    up = h2 @ p["wu"]
    return (gate * up) @ p["wd"] + residual


# --------------------------------- main --------------------------------------
if __name__ == "__main__":
    key = jax.random.PRNGKey(0)
    ks = jax.random.split(key, 12)

    def init(k, shape, scale=0.02):
        return jax.random.normal(k, shape, dtype=jnp.float32) * scale

    params = {
        "input_ln": init(ks[0], (HIDDEN,), 0.1),
        "post_ln": init(ks[1], (HIDDEN,), 0.1),
        "wq": init(ks[2], (HIDDEN, NUM_HEADS * HEAD_DIM)),
        "wk": init(ks[3], (HIDDEN, NUM_KV_HEADS * HEAD_DIM)),
        "wv": init(ks[4], (HIDDEN, NUM_KV_HEADS * HEAD_DIM)),
        "wo": init(ks[5], (NUM_HEADS * HEAD_DIM, HIDDEN)),
        "wg": init(ks[6], (HIDDEN, INTERMEDIATE)),
        "wu": init(ks[7], (HIDDEN, INTERMEDIATE)),
        "wd": init(ks[8], (INTERMEDIATE, HIDDEN)),
    }

    hidden_states = jax.random.normal(ks[9], (BATCH, SEQ, HIDDEN),
                                      dtype=jnp.float32)
    position_ids = jnp.broadcast_to(jnp.arange(SEQ, dtype=jnp.int32)[None, :],
                                    (BATCH, SEQ))
    causal = jnp.triu(jnp.ones((SEQ, SEQ), dtype=bool), k=1)
    attention_mask = jnp.where(causal, -1e9, 0.0).astype(jnp.float32)
    attention_mask = jnp.broadcast_to(attention_mask, (BATCH, SEQ, SEQ))

    out = gemma_decoder_layer(hidden_states, attention_mask, position_ids,
                              params)
    out = jax.block_until_ready(out)

    ref = jax.block_until_ready(
        reference_layer(hidden_states, attention_mask, position_ids, params))

    if not np.allclose(np.asarray(out), np.asarray(ref), rtol=1e-2, atol=1e-2):
        raise AssertionError("Pallas output does not match JAX reference")

    print("KERNEL_OK")
</pallas_src>

<mosaic_0001>
module attributes {stable_mosaic.version = 11 : i64} {
  func.func @gemma_layer_kernel(%arg0: memref<16x32xf32, #tpu.memory_space<vmem>>, %arg1: memref<2x8x8xf32, #tpu.memory_space<vmem>>, %arg2: memref<16x32xf32, #tpu.memory_space<vmem>>, %arg3: memref<2x32xf32, #tpu.memory_space<vmem>>, %arg4: memref<32x224xf32, #tpu.memory_space<vmem>>, %arg5: memref<64x64xf32, #tpu.memory_space<vmem>>, %arg6: memref<32x128xf32, #tpu.memory_space<vmem>>, %arg7: memref<16x32xf32, #tpu.memory_space<vmem>>) attributes {dimension_semantics = [], scalar_prefetch = 0 : i64, scratch_operands = 0 : i64, tpu.core_type = #tpu.core_type<tc>} {
    %c0 = arith.constant 0 : index
    %c0_0 = arith.constant 0 : index
    %0 = vector.load %arg0[%c0, %c0_0] : memref<16x32xf32, #tpu.memory_space<vmem>>, vector<16x32xf32>
    %c0_1 = arith.constant 0 : index
    %c0_2 = arith.constant 0 : index
    %1 = vector.load %arg3[%c0_1, %c0_2] : memref<2x32xf32, #tpu.memory_space<vmem>>, vector<2x32xf32>
    %2 = vector.extract_strided_slice %1 {offsets = [0, 0], sizes = [1, 32], strides = [1, 1]} : vector<2x32xf32> to vector<1x32xf32>
    %3 = arith.mulf %0, %0 : vector<16x32xf32>
    %cst = arith.constant dense<0.000000e+00> : vector<16xf32>
    %4 = vector.multi_reduction <add>, %3, %cst [1] : vector<16x32xf32> to vector<16xf32>
    %5 = vector.shape_cast %4 : vector<16xf32> to vector<16x1xf32>
    %cst_3 = arith.constant 3.200000e+01 : f32
    %6 = vector.broadcast %cst_3 : f32 to vector<16x1xf32>
    %7 = arith.divf %5, %6 : vector<16x1xf32>
    %cst_4 = arith.constant 9.99999997E-7 : f32
    %8 = vector.broadcast %cst_4 : f32 to vector<16x1xf32>
    %9 = arith.addf %7, %8 : vector<16x1xf32>
    %10 = math.rsqrt %9 : vector<16x1xf32>
    %11 = vector.broadcast %10 : vector<16x1xf32> to vector<16x32xf32>
    %12 = arith.mulf %0, %11 : vector<16x32xf32>
    %cst_5 = arith.constant 1.000000e+00 : f32
    %13 = vector.broadcast %cst_5 : f32 to vector<1x32xf32>
    %14 = arith.addf %13, %2 : vector<1x32xf32>
    %15 = vector.broadcast %14 : vector<1x32xf32> to vector<16x32xf32>
    %16 = arith.mulf %12, %15 : vector<16x32xf32>
    %c0_6 = arith.constant 0 : index
    %c0_7 = arith.constant 0 : index
    %17 = vector.load %arg4[%c0_6, %c0_7] : memref<32x224xf32, #tpu.memory_space<vmem>>, vector<32x224xf32>
    %cst_8 = arith.constant dense<0.000000e+00> : vector<16x224xf32>
    %18 = tpu.matmul %16, %17, %cst_8 {dimension_numbers = #tpu.dot_dimension_numbers<[1], [0], [0], [1], [0, 0, 1, 1], [], []>} : vector<16x32xf32>, vector<32x224xf32>, vector<16x224xf32> -> vector<16x224xf32>
    %c0_9 = arith.constant 0 : index
    %c0_10 = arith.constant 0 : index
    %19 = vector.load %arg2[%c0_9, %c0_10] : memref<16x32xf32, #tpu.memory_space<vmem>>, vector<16x32xf32>
    %20 = vector.extract_strided_slice %19 {offsets = [0, 0], sizes = [16, 16], strides = [1, 1]} : vector<16x32xf32> to vector<16x16xf32>
    %21 = vector.extract_strided_slice %19 {offsets = [0, 16], sizes = [16, 16], strides = [1, 1]} : vector<16x32xf32> to vector<16x16xf32>
    %c0_11 = arith.constant 0 : index
    %c0_12 = arith.constant 0 : index
    %c0_13 = arith.constant 0 : index
    %22 = vector.load %arg1[%c0_11, %c0_12, %c0_13] : memref<2x8x8xf32, #tpu.memory_space<vmem>>, vector<2x8x8xf32>
    %c0_14 = arith.constant 0 : index
    %c0_15 = arith.constant 0 : index
    %23 = vector.load %arg5[%c0_14, %c0_15] : memref<64x64xf32, #tpu.memory_space<vmem>>, vector<64x64xf32>
    %24 = vector.extract_strided_slice %23 {offsets = [0, 0], sizes = [64, 32], strides = [1, 1]} : vector<64x64xf32> to vector<64x32xf32>
    %25 = vector.extract_strided_slice %23 {offsets = [0, 32], sizes = [64, 32], strides = [1, 1]} : vector<64x64xf32> to vector<64x32xf32>
    %26 = vector.extract_strided_slice %18 {offsets = [0, 64], sizes = [16, 16], strides = [1, 1]} : vector<16x224xf32> to vector<16x16xf32>
    %27 = arith.mulf %26, %20 : vector<16x16xf32>
    %28 = vector.extract_strided_slice %18 {offsets = [0, 192], sizes = [16, 16], strides = [1, 1]} : vector<16x224xf32> to vector<16x16xf32>
    %29 = arith.mulf %28, %21 : vector<16x16xf32>
    %30 = arith.addf %27, %29 : vector<16x16xf32>
    %31 = vector.shape_cast %30 : vector<16x16xf32> to vector<2x8x16xf32>
    %32 = vector.extract_strided_slice %18 {offsets = [0, 96], sizes = [16, 16], strides = [1, 1]} : vector<16x224xf32> to vector<16x16xf32>
    %33 = vector.shape_cast %32 : vector<16x16xf32> to vector<2x8x16xf32>
    %34 = vector.extract_strided_slice %18 {offsets = [0, 0], sizes = [16, 16], strides = [1, 1]} : vector<16x224xf32> to vector<16x16xf32>
    %35 = arith.mulf %34, %20 : vector<16x16xf32>
    %36 = vector.extract_strided_slice %18 {offsets = [0, 128], sizes = [16, 16], strides = [1, 1]} : vector<16x224xf32> to vector<16x16xf32>
    %37 = arith.mulf %36, %21 : vector<16x16xf32>
    %38 = arith.addf %35, %37 : vector<16x16xf32>
    %39 = vector.shape_cast %38 : vector<16x16xf32> to vector<2x8x16xf32>
    "tpu.trace_start"() <{level = 10 : i32, message = "bqd,bkd->bqk"}> : () -> ()
    %cst_16 = arith.constant dense<0.000000e+00> : vector<2x8x8xf32>
    %40 = tpu.matmul %39, %31, %cst_16 {dimension_numbers = #tpu.dot_dimension_numbers<[2], [2], [1], [1], [0, 0, 0, 1, 1, 1], [0], [0]>} : vector<2x8x16xf32>, vector<2x8x16xf32>, vector<2x8x8xf32> -> vector<2x8x8xf32>
    "tpu.trace_stop"() : () -> ()
    %cst_17 = arith.constant 2.500000e-01 : f32
    %41 = vector.broadcast %cst_17 : f32 to vector<2x8x8xf32>
    %42 = arith.mulf %40, %41 : vector<2x8x8xf32>
    %43 = arith.addf %42, %22 : vector<2x8x8xf32>
    %cst_18 = arith.constant dense<0xFF800000> : vector<2x8xf32>
    %44 = vector.multi_reduction <maximumf>, %43, %cst_18 [2] : vector<2x8x8xf32> to vector<2x8xf32>
    %45 = vector.shape_cast %44 : vector<2x8xf32> to vector<2x8x1xf32>
    %46 = vector.broadcast %45 : vector<2x8x1xf32> to vector<2x8x8xf32>
    %47 = arith.subf %43, %46 : vector<2x8x8xf32>
    %48 = math.exp %47 : vector<2x8x8xf32>
    %cst_19 = arith.constant dense<0.000000e+00> : vector<2x8xf32>
    %49 = vector.multi_reduction <add>, %48, %cst_19 [2] : vector<2x8x8xf32> to vector<2x8xf32>
    %50 = vector.shape_cast %49 : vector<2x8xf32> to vector<2x8x1xf32>
    %51 = vector.broadcast %50 : vector<2x8x1xf32> to vector<2x8x8xf32>
    %52 = arith.divf %48, %51 : vector<2x8x8xf32>
    "tpu.trace_start"() <{level = 10 : i32, message = "bqk,bkd->bqd"}> : () -> ()
    %cst_20 = arith.constant dense<0.000000e+00> : vector<2x8x16xf32>
    %53 = tpu.matmul %52, %33, %cst_20 {dimension_numbers = #tpu.dot_dimension_numbers<[2], [1], [1], [2], [0, 0, 0, 1, 1, 2], [0], [0]>} : vector<2x8x8xf32>, vector<2x8x16xf32>, vector<2x8x16xf32> -> vector<2x8x16xf32>
    "tpu.trace_stop"() : () -> ()
    %54 = vector.shape_cast %53 : vector<2x8x16xf32> to vector<16x16xf32>
    %55 = vector.extract_strided_slice %24 {offsets = [0, 0], sizes = [16, 32], strides = [1, 1]} : vector<64x32xf32> to vector<16x32xf32>
    %cst_21 = arith.constant dense<0.000000e+00> : vector<16x32xf32>
    %56 = tpu.matmul %54, %55, %cst_21 {dimension_numbers = #tpu.dot_dimension_numbers<[1], [0], [0], [1], [0, 0, 1, 1], [], []>} : vector<16x16xf32>, vector<16x32xf32>, vector<16x32xf32> -> vector<16x32xf32>
    %57 = arith.addf %0, %56 : vector<16x32xf32>
    %58 = vector.extract_strided_slice %18 {offsets = [0, 16], sizes = [16, 16], strides = [1, 1]} : vector<16x224xf32> to vector<16x16xf32>
    %59 = arith.mulf %58, %20 : vector<16x16xf32>
    %60 = vector.extract_strided_slice %18 {offsets = [0, 144], sizes = [16, 16], strides = [1, 1]} : vector<16x224xf32> to vector<16x16xf32>
    %61 = arith.mulf %60, %21 : vector<16x16xf32>
    %62 = arith.addf %59, %61 : vector<16x16xf32>
    %63 = vector.shape_cast %62 : vector<16x16xf32> to vector<2x8x16xf32>
    "tpu.trace_start"() <{level = 10 : i32, message = "bqd,bkd->bqk"}> : () -> ()
    %cst_22 = arith.constant dense<0.000000e+00> : vector<2x8x8xf32>
    %64 = tpu.matmul %63, %31, %cst_22 {dimension_numbers = #tpu.dot_dimension_numbers<[2], [2], [1], [1], [0, 0, 0, 1, 1, 1], [0], [0]>} : vector<2x8x16xf32>, vector<2x8x16xf32>, vector<2x8x8xf32> -> vector<2x8x8xf32>
    "tpu.trace_stop"() : () -> ()
    %cst_23 = arith.constant 2.500000e-01 : f32
    %65 = vector.broadcast %cst_23 : f32 to vector<2x8x8xf32>
    %66 = arith.mulf %64, %65 : vector<2x8x8xf32>
    %67 = arith.addf %66, %22 : vector<2x8x8xf32>
    %cst_24 = arith.constant dense<0xFF800000> : vector<2x8xf32>
    %68 = vector.multi_reduction <maximumf>, %67, %cst_24 [2] : vector<2x8x8xf32> to vector<2x8xf32>
    %69 = vector.shape_cast %68 : vector<2x8xf32> to vector<2x8x1xf32>
    %70 = vector.broadcast %69 : vector<2x8x1xf32> to vector<2x8x8xf32>
    %71 = arith.subf %67, %70 : vector<2x8x8xf32>
    %72 = math.exp %71 : vector<2x8x8xf32>
    %cst_25 = arith.constant dense<0.000000e+00> : vector<2x8xf32>
    %73 = vector.multi_reduction <add>, %72, %cst_25 [2] : vector<2x8x8xf32> to vector<2x8xf32>
    %74 = vector.shape_cast %73 : vector<2x8xf32> to vector<2x8x1xf32>
    %75 = vector.broadcast %74 : vector<2x8x1xf32> to vector<2x8x8xf32>
    %76 = arith.divf %72, %75 : vector<2x8x8xf32>
    "tpu.trace_start"() <{level = 10 : i32, message = "bqk,bkd->bqd"}> : () -> ()
    %cst_26 = arith.constant dense<0.000000e+00> : vector<2x8x16xf32>
    %77 = tpu.matmul %76, %33, %cst_26 {dimension_numbers = #tpu.dot_dimension_numbers<[2], [1], [1], [2], [0, 0, 0, 1, 1, 2], [0], [0]>} : vector<2x8x8xf32>, vector<2x8x16xf32>, vector<2x8x16xf32> -> vector<2x8x16xf32>
    "tpu.trace_stop"() : () -> ()
    %78 = vector.shape_cast %77 : vector<2x8x16xf32> to vector<16x16xf32>
    %79 = vector.extract_strided_slice %24 {offsets = [16, 0], sizes = [16, 32], strides = [1, 1]} : vector<64x32xf32> to vector<16x32xf32>
    %cst_27 = arith.constant dense<0.000000e+00> : vector<16x32xf32>
    %80 = tpu.matmul %78, %79, %cst_27 {dimension_numbers = #tpu.dot_dimension_numbers<[1], [0], [0], [1], [0, 0, 1, 1], [], []>} : vector<16x16xf32>, vector<16x32xf32>, vector<16x32xf32> -> vector<16x32xf32>
    %81 = arith.addf %57, %80 : vector<16x32xf32>
    %82 = vector.extract_strided_slice %18 {offsets = [0, 80], sizes = [16, 16], strides = [1, 1]} : vector<16x224xf32> to vector<16x16xf32>
    %83 = arith.mulf %82, %20 : vector<16x16xf32>
    %84 = vector.extract_strided_slice %18 {offsets = [0, 208], sizes = [16, 16], strides = [1, 1]} : vector<16x224xf32> to vector<16x16xf32>
    %85 = arith.mulf %84, %21 : vector<16x16xf32>
    %86 = arith.addf %83, %85 : vector<16x16xf32>
    %87 = vector.shape_cast %86 : vector<16x16xf32> to vector<2x8x16xf32>
    %88 = vector.extract_strided_slice %18 {offsets = [0, 112], sizes = [16, 16], strides = [1, 1]} : vector<16x224xf32> to vector<16x16xf32>
    %89 = vector.shape_cast %88 : vector<16x16xf32> to vector<2x8x16xf32>
    %90 = vector.extract_strided_slice %18 {offsets = [0, 32], sizes = [16, 16], strides = [1, 1]} : vector<16x224xf32> to vector<16x16xf32>
    %91 = arith.mulf %90, %20 : vector<16x16xf32>
    %92 = vector.extract_strided_slice %18 {offsets = [0, 160], sizes = [16, 16], strides = [1, 1]} : vector<16x224xf32> to vector<16x16xf32>
    %93 = arith.mulf %92, %21 : vector<16x16xf32>
    %94 = arith.addf %91, %93 : vector<16x16xf32>
    %95 = vector.shape_cast %94 : vector<16x16xf32> to vector<2x8x16xf32>
    "tpu.trace_start"() <{level = 10 : i32, message = "bqd,bkd->bqk"}> : () -> ()
    %cst_28 = arith.constant dense<0.000000e+00> : vector<2x8x8xf32>
    %96 = tpu.matmul %95, %87, %cst_28 {dimension_numbers = #tpu.dot_dimension_numbers<[2], [2], [1], [1], [0, 0, 0, 1, 1, 1], [0], [0]>} : vector<2x8x16xf32>, vector<2x8x16xf32>, vector<2x8x8xf32> -> vector<2x8x8xf32>
    "tpu.trace_stop"() : () -> ()
    %cst_29 = arith.constant 2.500000e-01 : f32
    %97 = vector.broadcast %cst_29 : f32 to vector<2x8x8xf32>
    %98 = arith.mulf %96, %97 : vector<2x8x8xf32>
    %99 = arith.addf %98, %22 : vector<2x8x8xf32>
    %cst_30 = arith.constant dense<0xFF800000> : vector<2x8xf32>
    %100 = vector.multi_reduction <maximumf>, %99, %cst_30 [2] : vector<2x8x8xf32> to vector<2x8xf32>
    %101 = vector.shape_cast %100 : vector<2x8xf32> to vector<2x8x1xf32>
    %102 = vector.broadcast %101 : vector<2x8x1xf32> to vector<2x8x8xf32>
    %103 = arith.subf %99, %102 : vector<2x8x8xf32>
    %104 = math.exp %103 : vector<2x8x8xf32>
    %cst_31 = arith.constant dense<0.000000e+00> : vector<2x8xf32>
    %105 = vector.multi_reduction <add>, %104, %cst_31 [2] : vector<2x8x8xf32> to vector<2x8xf32>
    %106 = vector.shape_cast %105 : vector<2x8xf32> to vector<2x8x1xf32>
    %107 = vector.broadcast %106 : vector<2x8x1xf32> to vector<2x8x8xf32>
    %108 = arith.divf %104, %107 : vector<2x8x8xf32>
    "tpu.trace_start"() <{level = 10 : i32, message = "bqk,bkd->bqd"}> : () -> ()
    %cst_32 = arith.constant dense<0.000000e+00> : vector<2x8x16xf32>
    %109 = tpu.matmul %108, %89, %cst_32 {dimension_numbers = #tpu.dot_dimension_numbers<[2], [1], [1], [2], [0, 0, 0, 1, 1, 2], [0], [0]>} : vector<2x8x8xf32>, vector<2x8x16xf32>, vector<2x8x16xf32> -> vector<2x8x16xf32>
    "tpu.trace_stop"() : () -> ()
    %110 = vector.shape_cast %109 : vector<2x8x16xf32> to vector<16x16xf32>
    %111 = vector.extract_strided_slice %24 {offsets = [32, 0], sizes = [16, 32], strides = [1, 1]} : vector<64x32xf32> to vector<16x32xf32>
    %cst_33 = arith.constant dense<0.000000e+00> : vector<16x32xf32>
    %112 = tpu.matmul %110, %111, %cst_33 {dimension_numbers = #tpu.dot_dimension_numbers<[1], [0], [0], [1], [0, 0, 1, 1], [], []>} : vector<16x16xf32>, vector<16x32xf32>, vector<16x32xf32> -> vector<16x32xf32>
    %113 = arith.addf %81, %112 : vector<16x32xf32>
    %114 = vector.extract_strided_slice %18 {offsets = [0, 48], sizes = [16, 16], strides = [1, 1]} : vector<16x224xf32> to vector<16x16xf32>
    %115 = arith.mulf %114, %20 : vector<16x16xf32>
    %116 = vector.extract_strided_slice %18 {offsets = [0, 176], sizes = [16, 16], strides = [1, 1]} : vector<16x224xf32> to vector<16x16xf32>
    %117 = arith.mulf %116, %21 : vector<16x16xf32>
    %118 = arith.addf %115, %117 : vector<16x16xf32>
    %119 = vector.shape_cast %118 : vector<16x16xf32> to vector<2x8x16xf32>
    "tpu.trace_start"() <{level = 10 : i32, message = "bqd,bkd->bqk"}> : () -> ()
    %cst_34 = arith.constant dense<0.000000e+00> : vector<2x8x8xf32>
    %120 = tpu.matmul %119, %87, %cst_34 {dimension_numbers = #tpu.dot_dimension_numbers<[2], [2], [1], [1], [0, 0, 0, 1, 1, 1], [0], [0]>} : vector<2x8x16xf32>, vector<2x8x16xf32>, vector<2x8x8xf32> -> vector<2x8x8xf32>
    "tpu.trace_stop"() : () -> ()
    %cst_35 = arith.constant 2.500000e-01 : f32
    %121 = vector.broadcast %cst_35 : f32 to vector<2x8x8xf32>
    %122 = arith.mulf %120, %121 : vector<2x8x8xf32>
    %123 = arith.addf %122, %22 : vector<2x8x8xf32>
    %cst_36 = arith.constant dense<0xFF800000> : vector<2x8xf32>
    %124 = vector.multi_reduction <maximumf>, %123, %cst_36 [2] : vector<2x8x8xf32> to vector<2x8xf32>
    %125 = vector.shape_cast %124 : vector<2x8xf32> to vector<2x8x1xf32>
    %126 = vector.broadcast %125 : vector<2x8x1xf32> to vector<2x8x8xf32>
    %127 = arith.subf %123, %126 : vector<2x8x8xf32>
    %128 = math.exp %127 : vector<2x8x8xf32>
    %cst_37 = arith.constant dense<0.000000e+00> : vector<2x8xf32>
    %129 = vector.multi_reduction <add>, %128, %cst_37 [2] : vector<2x8x8xf32> to vector<2x8xf32>
    %130 = vector.shape_cast %129 : vector<2x8xf32> to vector<2x8x1xf32>
    %131 = vector.broadcast %130 : vector<2x8x1xf32> to vector<2x8x8xf32>
    %132 = arith.divf %128, %131 : vector<2x8x8xf32>
    "tpu.trace_start"() <{level = 10 : i32, message = "bqk,bkd->bqd"}> : () -> ()
    %cst_38 = arith.constant dense<0.000000e+00> : vector<2x8x16xf32>
    %133 = tpu.matmul %132, %89, %cst_38 {dimension_numbers = #tpu.dot_dimension_numbers<[2], [1], [1], [2], [0, 0, 0, 1, 1, 2], [0], [0]>} : vector<2x8x8xf32>, vector<2x8x16xf32>, vector<2x8x16xf32> -> vector<2x8x16xf32>
    "tpu.trace_stop"() : () -> ()
    %134 = vector.shape_cast %133 : vector<2x8x16xf32> to vector<16x16xf32>
    %135 = vector.extract_strided_slice %24 {offsets = [48, 0], sizes = [16, 32], strides = [1, 1]} : vector<64x32xf32> to vector<16x32xf32>
    %cst_39 = arith.constant dense<0.000000e+00> : vector<16x32xf32>
    %136 = tpu.matmul %134, %135, %cst_39 {dimension_numbers = #tpu.dot_dimension_numbers<[1], [0], [0], [1], [0, 0, 1, 1], [], []>} : vector<16x16xf32>, vector<16x32xf32>, vector<16x32xf32> -> vector<16x32xf32>
    %137 = arith.addf %113, %136 : vector<16x32xf32>
    %138 = vector.extract_strided_slice %1 {offsets = [1, 0], sizes = [1, 32], strides = [1, 1]} : vector<2x32xf32> to vector<1x32xf32>
    %139 = arith.mulf %137, %137 : vector<16x32xf32>
    %cst_40 = arith.constant dense<0.000000e+00> : vector<16xf32>
    %140 = vector.multi_reduction <add>, %139, %cst_40 [1] : vector<16x32xf32> to vector<16xf32>
    %141 = vector.shape_cast %140 : vector<16xf32> to vector<16x1xf32>
    %cst_41 = arith.constant 3.200000e+01 : f32
    %142 = vector.broadcast %cst_41 : f32 to vector<16x1xf32>
    %143 = arith.divf %141, %142 : vector<16x1xf32>
    %cst_42 = arith.constant 9.99999997E-7 : f32
    %144 = vector.broadcast %cst_42 : f32 to vector<16x1xf32>
    %145 = arith.addf %143, %144 : vector<16x1xf32>
    %146 = math.rsqrt %145 : vector<16x1xf32>
    %147 = vector.broadcast %146 : vector<16x1xf32> to vector<16x32xf32>
    %148 = arith.mulf %137, %147 : vector<16x32xf32>
    %cst_43 = arith.constant 1.000000e+00 : f32
    %149 = vector.broadcast %cst_43 : f32 to vector<1x32xf32>
    %150 = arith.addf %149, %138 : vector<1x32xf32>
    %151 = vector.broadcast %150 : vector<1x32xf32> to vector<16x32xf32>
    %152 = arith.mulf %148, %151 : vector<16x32xf32>
    %c0_44 = arith.constant 0 : index
    %c0_45 = arith.constant 0 : index
    %153 = vector.load %arg6[%c0_44, %c0_45] : memref<32x128xf32, #tpu.memory_space<vmem>>, vector<32x128xf32>
    %cst_46 = arith.constant dense<0.000000e+00> : vector<16x128xf32>
    %154 = tpu.matmul %152, %153, %cst_46 {dimension_numbers = #tpu.dot_dimension_numbers<[1], [0], [0], [1], [0, 0, 1, 1], [], []>} : vector<16x32xf32>, vector<32x128xf32>, vector<16x128xf32> -> vector<16x128xf32>
    %155 = vector.extract_strided_slice %154 {offsets = [0, 0], sizes = [16, 64], strides = [1, 1]} : vector<16x128xf32> to vector<16x64xf32>
    %156 = arith.mulf %155, %155 : vector<16x64xf32>
    %157 = arith.mulf %155, %156 : vector<16x64xf32>
    %cst_47 = arith.constant 4.471500e-02 : f32
    %158 = vector.broadcast %cst_47 : f32 to vector<16x64xf32>
    %159 = arith.mulf %158, %157 : vector<16x64xf32>
    %160 = arith.addf %155, %159 : vector<16x64xf32>
    %cst_48 = arith.constant 0.797884583 : f32
    %161 = vector.broadcast %cst_48 : f32 to vector<16x64xf32>
    %162 = arith.mulf %161, %160 : vector<16x64xf32>
    %163 = math.tanh %162 : vector<16x64xf32>
    %cst_49 = arith.constant 1.000000e+00 : f32
    %164 = vector.broadcast %cst_49 : f32 to vector<16x64xf32>
    %165 = arith.addf %164, %163 : vector<16x64xf32>
    %cst_50 = arith.constant 5.000000e-01 : f32
    %166 = vector.broadcast %cst_50 : f32 to vector<16x64xf32>
    %167 = arith.mulf %166, %165 : vector<16x64xf32>
    %168 = arith.mulf %155, %167 : vector<16x64xf32>
    %169 = vector.extract_strided_slice %154 {offsets = [0, 64], sizes = [16, 64], strides = [1, 1]} : vector<16x128xf32> to vector<16x64xf32>
    %170 = arith.mulf %168, %169 : vector<16x64xf32>
    %cst_51 = arith.constant dense<0.000000e+00> : vector<16x32xf32>
    %171 = tpu.matmul %170, %25, %cst_51 {dimension_numbers = #tpu.dot_dimension_numbers<[1], [0], [0], [1], [0, 0, 1, 1], [], []>} : vector<16x64xf32>, vector<64x32xf32>, vector<16x32xf32> -> vector<16x32xf32>
    %172 = arith.addf %171, %137 : vector<16x32xf32>
    %c0_52 = arith.constant 0 : index
    %c0_53 = arith.constant 0 : index
    %173 = vector.load %arg7[%c0_52, %c0_53] : memref<16x32xf32, #tpu.memory_space<vmem>>, vector<16x32xf32>
    tpu.vector_store %arg7[%c0_52, %c0_53], %172 {strides = array<i32>} : memref<16x32xf32, #tpu.memory_space<vmem>>, vector<16x32xf32>,
    return
  }
}

</mosaic_0001>

<bundles_post_ra>
// kernel: tpu_custom_call.1
= control target key start
LH: loop header
LB: loop body
LE: loop exit
PB: predicated region body
PF: predicated region fallthrough
CT: control target
= control target key end

     0   :  { %12 = vsyncpa [#allocation3], 0  ;;  %s3134_s0 = inlined_call_operand.hbm [shape: f32[16,32], index: 0, kind: input, shape index: {}]   ;;  %s3135_s1 = inlined_call_operand.hbm [shape: f32[2,8,8], index: 1, kind: input, shape index: {}]   ;;  %s3136_s2 = inlined_call_operand.hbm [shape: f32[16,32], index: 2, kind: input, shape index: {}]   ;;  %s3137_s3 = inlined_call_operand.vmem [shape: f32[2,32], index: 3, kind: input, shape index: {}]   ;;  %s3138_s4 = inlined_call_operand.hbm [shape: f32[32,224], index: 4, kind: input, shape index: {}]   ;;  %s3139_s5 = inlined_call_operand.hbm [shape: f32[64,64], index: 5, kind: input, shape index: {}]   ;;  %s3140_s6 = inlined_call_operand.hbm [shape: f32[32,128], index: 6, kind: input, shape index: {}]   ;;  %s3141_s7 = inlined_call_operand.hbm [shape: f32[16,32], index: 7, kind: output, shape index: {}]  }
   0x1   :  { %13 = vsyncpa [#allocation6], 0 }
   0x2   :  { %14 = vsyncpa [#allocation9], 0 }
   0x3   :  { %15 = vsyncpa [#allocation12], 0 }
   0x4   :  { %16 = vsyncpa [#allocation4], 0  ;;  %s2698_s24 = smov [#allocation5]   ;;  %s2699_s26 = smov [#allocation8]  }
   0x5   :  { %s34_s25 = sshll.u32 %s2698_s24, 4  ;;  %s60_s27 = sshll.u32 %s2699_s26, 4  ;;  %s35_s25 = int_to_ptr.vmem [resolvable:$true] %s34_s25  ;;  %s61_s27 = int_to_ptr.vmem [resolvable:$true] %s60_s27 }
   0x6   :  { %s2556_s28 = scalar_lea.vmem %s35_s25, 256  ;;  %p2561_p1 = scmp.lt.s32.totalorder %s35_s25, %s35_s25 }
   0x7   :  { %p2557_p0 = scmp.ne.s32.totalorder %s35_s25, %s2556_s28  ;;  %p2562_p2 = scmp.lt.s32.totalorder %s2556_s28, %s2556_s28 }
   0x9   :  { %p2563_p3 = por %p2562_p2, %p2561_p1 }
   0xb   :  { %p2564_p4 = pnand %p2563_p3, %p2557_p0 }
   0xd   :  { %2567 = shalt.err (!%p2564_p4)
}
   0xe   :  { %s2700_s29 = smov 128   ;;  %s2701_s30 = smov 8  }
   0xf   :  { %40 = dma.hbm_to_vmem [thread:$0]  %s3135_s1, 256, %s35_s25, [#allocation6], %s2700_s29, %s2700_s29, %s2701_s30  }
  0x10   :  { %s2576_s10 = scalar_lea.vmem %s61_s27, 1024  ;;  %p2581_p6 = scmp.lt.s32.totalorder %s61_s27, %s61_s27 }
  0x11   :  { %p2577_p5 = scmp.ne.s32.totalorder %s61_s27, %s2576_s10  ;;  %p2582_p7 = scmp.lt.s32.totalorder %s2576_s10, %s2576_s10 }
  0x13   :  { %p2583_p8 = por %p2582_p7, %p2581_p6 }
  0x15   :  { %p2584_p9 = pnand %p2583_p8, %p2577_p5 }
  0x17   :  { %2587 = shalt.err (!%p2584_p9)
}
  0x18   :  { %s2702_s11 = smov 256   ;;  %s2703_s12 = smov 16  }
  0x19   :  { %66 = dma.hbm_to_vmem [thread:$0]  %s3138_s4, 1024, %s61_s27, [#allocation9], %s2702_s11, %s2702_s11, %s2703_s12  }
  0x1a   :  { %s2704_s15 = smov [#allocation2]   ;;  %s2705_s17 = smov [#allocation7]  }
  0x1b   :  { %s22_s16 = sshll.u32 %s2704_s15, 4  ;;  %s46_s18 = sshll.u32 %s2705_s17, 4  ;;  %s23_s16 = int_to_ptr.vmem [resolvable:$true] %s22_s16  ;;  %s47_s18 = int_to_ptr.vmem [resolvable:$true] %s46_s18 }
  0x1c   :  { %s2596_s1 = scalar_lea.vmem %s23_s16, 256  ;;  %p2601_p11 = scmp.lt.s32.totalorder %s23_s16, %s23_s16 }
  0x1d   :  { %p2597_p10 = scmp.ne.s32.totalorder %s23_s16, %s2596_s1  ;;  %p2602_p12 = scmp.lt.s32.totalorder %s2596_s1, %s2596_s1 }
  0x1f   :  { %p2603_p13 = por %p2602_p12, %p2601_p11 }
  0x21   :  { %p2604_p0 = pnand %p2603_p13, %p2597_p10 }
  0x23   :  { %2607 = shalt.err (!%p2604_p0)
}
  0x24   :  { %28 = dma.hbm_to_vmem [thread:$0]  %s3134_s0, 256, %s23_s16, [#allocation3], %s2700_s29, %s2700_s29, %s2701_s30  }
  0x25   :  { %s2616_s4 = scalar_lea.vmem %s47_s18, 256  ;;  %p2621_p2 = scmp.lt.s32.totalorder %s47_s18, %s47_s18 }
  0x26   :  { %p2617_p1 = scmp.ne.s32.totalorder %s47_s18, %s2616_s4  ;;  %p2622_p3 = scmp.lt.s32.totalorder %s2616_s4, %s2616_s4 }
  0x28   :  { %p2623_p4 = por %p2622_p3, %p2621_p2 }
  0x2a   :  { %p2624_p5 = pnand %p2623_p4, %p2617_p1 }
  0x2c   :  { %2627 = shalt.err (!%p2624_p5)
}
  0x2d   :  { %52 = dma.hbm_to_vmem [thread:$0]  %s3136_s2, 256, %s47_s18, [#allocation6], %s2700_s29, %s2700_s29, %s2701_s30  }
  0x2e   :  { %s2706_s23 = smov [#allocation10]   ;;  %s2707_s25 = smov [#allocation11]  }
  0x2f   :  { %s72_s24 = sshll.u32 %s2706_s23, 4  ;;  %s84_s26 = sshll.u32 %s2707_s25, 4  ;;  %s73_s24 = int_to_ptr.vmem [resolvable:$true] %s72_s24  ;;  %s85_s26 = int_to_ptr.vmem [resolvable:$true] %s84_s26 }
  0x30   :  { %s2636_s0 = scalar_lea.vmem %s73_s24, 1024  ;;  %p2641_p7 = scmp.lt.s32.totalorder %s73_s24, %s73_s24 }
  0x31   :  { %p2637_p6 = scmp.ne.s32.totalorder %s73_s24, %s2636_s0  ;;  %p2642_p8 = scmp.lt.s32.totalorder %s2636_s0, %s2636_s0 }
  0x33   :  { %p2643_p9 = por %p2642_p8, %p2641_p7 }
  0x35   :  { %p2644_p10 = pnand %p2643_p9, %p2637_p6 }
  0x37   :  { %2647 = shalt.err (!%p2644_p10)
}
  0x38   :  { %78 = dma.hbm_to_vmem [thread:$0]  %s3139_s5, 1024, %s73_s24, [#allocation9], %s2700_s29, %s2700_s29, %s2701_s30  }
  0x39   :  { %s2656_s2 = scalar_lea.vmem %s85_s26, 512  ;;  %p2661_p12 = scmp.lt.s32.totalorder %s85_s26, %s85_s26 }
  0x3a   :  { %p2657_p11 = scmp.ne.s32.totalorder %s85_s26, %s2656_s2  ;;  %p2662_p13 = scmp.lt.s32.totalorder %s2656_s2, %s2656_s2 }
  0x3c   :  { %p2663_p0 = por %p2662_p13, %p2661_p12 }
  0x3e   :  { %p2664_p1 = pnand %p2663_p0, %p2657_p11 }
  0x40   :  { %2667 = shalt.err (!%p2664_p1)
}
  0x41   :  { %90 = dma.hbm_to_vmem [thread:$0]  %s3140_s6, 512, %s85_s26, [#allocation12], %s2700_s29, %s2700_s29, %s2701_s30  }
  0x42   :  { %2688 = dma.done.wait [#allocation3], 256  }
  0x43   :  { %2689 = vsyncadd [#allocation3], 4294967040 }
  0x44   :  { %2690 = dma.done.wait [#allocation6], 512  }
  0x45   :  { %2691 = vsyncadd [#allocation6], 4294966784 }
  0x46   :  { %2692 = dma.done.wait [#allocation9], 2048  }
  0x47   :  { %2693 = vsyncadd [#allocation9], 4294965248 }
  0x48   :  { %2694 = dma.done.wait [#allocation12], 512  }
  0x49   :  { %2695 = vsyncadd [#allocation12], 4294966784  ;;  %v2791_v0 = vld [vmem:[#allocation2] sm:$0xff]  ;;  %vm114_vm0 = vcmask 261120   ;;  %v2793_v1 = vld [vmem:[#allocation2 + $0x8] sm:$0xff]  ;;  %v2708_v14 = vmov 0.0   ;;  %v131_v22 = vlaneseq }
  0x4a   :  { %v112_v2 = vmul.f32 %v2791_v0, %v2791_v0  ;;  %v113_v3 = vmul.f32 %v2793_v1, %v2793_v1  ;;  %v144_v6 = vld [vmem:[#allocation8 + $0x38] sm:$0xff]  ;;  %v143_v7 = vld [vmem:[#allocation8 + $0x30] sm:$0xff]  ;;  %v142_v8 = vld [vmem:[#allocation8 + $0x28] sm:$0xff]  ;;  %215 = vmatprep.mubr.f32.mxu0 %v2708_v14  ;;  %221 = vmatprep.mubr.f32.mxu1 %v2708_v14  ;;  %s2709_s5 = smov 64   ;;  %s2710_s6 = smov 48   ;;  %vm2712_vm1 = vmmov 0  }
  0x4b   :  { %175 = vmatprep.subr.mxu0 %v144_v6  ;;  %v141_v9 = vld [vmem:[#allocation8 + $0x20] sm:$0xff]  ;;  %2477 = vmatprep.subr.mxu1 %v144_v6  ;;  %v140_v10 = vld [vmem:[#allocation8 + $0x18] sm:$0xff]  ;;  %v139_v11 = vld [vmem:[#allocation8 + $0x10] sm:$0xff]  ;;  %s2711_s10 = smov 112   ;;  %v2821_v24 = vshrl.u32 %v131_v22, 7  ;;  %vm275_vm2 = vcmask 130048  }
  0x4c   :  { %v115_v4 = vsel %vm114_vm0, %v112_v2, 0.0  ;;  %v118_v5 = vsel %vm114_vm0, %v113_v3, 0.0  ;;  %176 = vmatpush1.msra.mxu0 %v143_v7  ;;  %2481 = vmatpush1.msra.mxu1 %v143_v7  ;;  %v138_v12 = vld [vmem:[#allocation8 + $0x8] sm:$0xff]  ;;  %v137_v13 = vld [vmem:[#allocation8] sm:$0xff]  ;;  %v2805_v15 = vld [vmem:[#allocation7] sm:$0xff]  ;;  %vm433_vm3 = vcmask 64512  }
  0x4d   :  { %116 = vadd.xlane.f32.xlu0 %v115_v4  ;;  %177 = vmatprep.subr.mxu0 %v142_v8  ;;  %v2807_v16 = vld [vmem:[#allocation7 + $0x8] sm:$0xff]  ;;  %v111_v25 = vld [vmem:[%s3137_s3] sm:$0x3]  ;;  %v133_v27 = vsub.s32 0, %v2821_v24  ;;  %v2886_v60 = vld [vmem:[#allocation5] sm:$0xff]  ;;  %s2713_s3 = smov 32  }
  0x4e   :  { %2478 = vmatprep.subr.mxu1 %v142_v8  ;;  %178 = vmatpush1.msra.mxu0 %v141_v9  ;;  %v2826_v26 = vadd.f32 1.0, %v111_v25  ;;  %v2889_v3 = vld [vmem:[#allocation5 + $0x8] sm:$0xff]  ;;  %s2714_s14 = smov 80   ;;  %s2715_s15 = smov 96   ;;  %vm2133_vm4 = vcmask 523264  }
  0x4f   :  { %2482 = vmatpush1.msra.mxu1 %v141_v9  ;;  %179 = vmatprep.subr.mxu0 %v140_v10 }
  0x50   :  { %180 = vmatpush1.msra.mxu0 %v139_v11  ;;  %2479 = vmatprep.subr.mxu1 %v140_v10  ;;  %v134_v28 = vrot.slane %v2826_v26, %v133_v27 }
  0x51   :  { %119 = vadd.xlane.f32.xlu0 %v118_v5  ;;  %181 = vmatprep.subr.mxu0 %v138_v12 }
  0x52   :  { %2483 = vmatpush1.msra.mxu1 %v139_v11  ;;  %182 = vmatpush1.msra.mxu0 %v137_v13 }
  0x53   :  { %2480 = vmatprep.subr.mxu1 %v138_v12  ;;  %2354 = vmatprep.subr.mxu0 %v2708_v14 }
  0x54   :  { %2484 = vmatpush1.msra.mxu1 %v137_v13  ;;  %242 = vrot.lane.b32.xlu1 %v2805_v15, %s2709_s5 }
  0x55   :  { %2339 = vmatprep.subr.mxu1 %v2708_v14 }
  0x58   :  { %250 = vrot.lane.b32.xlu1 %v2805_v15, %s2710_s6 }
  0x5c   :  { %252 = vrot.lane.b32.xlu1 %v2807_v16, %s2710_s6 }
  0x60   :  { %262 = vrot.lane.b32.xlu1 %v2805_v15, %s2711_s10 }
  0x64   :  { %264 = vrot.lane.b32.xlu1 %v2807_v16, %s2711_s10 }
  0x67   :  { %244 = vrot.lane.b32.xlu0 %v2807_v16, %s2709_s5 }
  0xc6   :  { %v2834_v35 = vpop.permute.xlu1 %242 }
  0xca   :  { %v2840_v36 = vpop.permute.xlu1 %250 }
  0xce   :  { %v2854_v44 = vpop.permute.xlu1 %252 }
  0xd2   :  { %v263_v49 = vpop.permute.xlu1 %262 }
  0xd6   :  { %v117_v17 = vpop.xlane.xlu0 %116  ;;  %v265_v50 = vpop.permute.xlu1 %264 }
  0xd7   :  { %v122_v18 = vmul.f32 0.03125, %v117_v17 }
  0xd9   :  { %v124_v19 = vadd.f32 1e-06, %v122_v18 }
  0xda   :  { %v120_v20 = vpop.xlane.xlu0 %119 }
  0xdb   :  { %2504 = vrsqrt.f32 %v124_v19  ;;  %v123_v21 = vmul.f32 0.03125, %v120_v20 }
  0xdd   :  { %v125_v23 = vadd.f32 1e-06, %v123_v21 }
  0xde   :  { %v2852_v42 = vpop.permute.xlu0 %244 }
  0xdf   :  { %2506 = vrsqrt.f32 %v125_v23 }
  0xe8   :  { %v2505_v29 = vpop.eup %2504 }
  0xe9   :  { %v128_v30 = vmul.f32 %v2505_v29, %v2791_v0 }
  0xeb   :  { %v135_v31 = vmul.f32 %v134_v28, %v128_v30 }
  0xec   :  { %v2507_v32 = vpop.eup %2506 }
  0xed   :  { %2237 = vmatmul.mubr.msk.f32.vlgmr.msra.gmra.mxu0 %vm114_vm0, %v135_v31  ;;  %v129_v33 = vmul.f32 %v2507_v32, %v2793_v1 }
  0xee   :  { %2356 = vmatprep.mubr.msk.f32.mxu0 %vm2712_vm1, %v2708_v14 }
  0xef   :  { %v136_v34 = vmul.f32 %v134_v28, %v129_v33 }
  0xf1   :  { %2238 = vmatmul.mubr.msk.f32.vlgmr.msra.gmra.mxu1 %vm114_vm0, %v136_v34 }
  0xf2   :  { %2341 = vmatprep.mubr.msk.f32.mxu1 %vm2712_vm1, %v2708_v14 }
 0x1ad   :  { %v2842_v37 = vpop.f32.mrf.mxu0 }
 0x1ae   :  { %v248_v39 = vmul.f32 %v2834_v35, %v2842_v37  ;;  %v260_v53 = vmul.f32 %v2805_v15, %v2842_v37 }
 0x1af   :  { %v2844_v38 = vpop.f32.mrf.mxu0 }
 0x1b0   :  { %v256_v40 = vmul.f32 %v2840_v36, %v2844_v38  ;;  %v268_v51 = vmul.f32 %v263_v49, %v2844_v38  ;;  %v701_v33 = vmul.f32 %v2805_v15, %v2844_v38  ;;  %v2930_v49 = vld [vmem:[#allocation10] sm:$0xff] }
 0x1b1   :  { %v2850_v41 = vpop.f32.mrf.mxu1 }
 0x1b2   :  { %v258_v43 = vadd.f32 %v256_v40, %v248_v39  ;;  %v249_v46 = vmul.f32 %v2852_v42, %v2850_v41  ;;  %v270_v55 = vadd.f32 %v268_v51, %v260_v53  ;;  %v261_v57 = vmul.f32 %v2807_v16, %v2850_v41 }
 0x1b3   :  { %v2856_v45 = vpop.f32.mrf.mxu1 }
 0x1b4   :  { %273 = vrot.lane.b32.xlu1 %v258_v43, %s2709_s5  ;;  %v257_v47 = vmul.f32 %v2854_v44, %v2856_v45  ;;  %v269_v54 = vmul.f32 %v265_v50, %v2856_v45  ;;  %v702_v29 = vmul.f32 %v2807_v16, %v2856_v45 }
 0x1b6   :  { %v259_v48 = vadd.f32 %v257_v47, %v249_v46  ;;  %v271_v58 = vadd.f32 %v269_v54, %v261_v57 }
 0x1b8   :  { %352 = vrot.lane.b32.xlu1 %v259_v48, %s2709_s5  ;;  %v2926_v48 = vld [vmem:[#allocation10 + $0x8] sm:$0xff] }
 0x226   :  { %v2865_v52 = vpop.permute.xlu1 %273 }
 0x227   :  { %2340 = vmatpush3.xpose.msk.msra.mxu1 %vm275_vm2, %v2865_v52 }
 0x228   :  { %2344 = vmatprep.subr.mxu1 %v2708_v14 }
 0x22a   :  { %2342 = vmatmul.mubr.msk.f32.vlgmr.msra.gmra.mxu1 %vm275_vm2, %v270_v55  ;;  %v2874_v56 = vpop.permute.xlu1 %352 }
 0x22b   :  { %2345 = vmatpush3.xpose.msk.msra.mxu1 %vm275_vm2, %v2874_v56  ;;  %2346 = vmatprep.mubr.msk.f32.mxu1 %vm2712_vm1, %v2708_v14 }
 0x22c   :  { %2349 = vmatprep.subr.mxu1 %v2708_v14 }
 0x22e   :  { %2347 = vmatmul.mubr.msk.f32.vlgmr.msra.gmra.mxu1 %vm275_vm2, %v271_v58 }
 0x22f   :  { %2351 = vmatprep.mubr.msk.f32.mxu1 %vm2712_vm1, %v2708_v14 }
 0x2ea   :  { %v347_v59 = vpop.f32.mrf.mxu1 }
 0x2eb   :  { %v429_v61 = vmul.f32 0.25, %v347_v59 }
 0x2ec   :  { %v2343_v62 = vpop.f32.mrf.mxu1 }
 0x2ed   :  { %v431_v63 = vadd.f32 %v429_v61, %v2886_v60 }
 0x2ee   :  { %v425_v2 = vpop.f32.mrf.mxu1 }
 0x2ef   :  { %v430_v4 = vmul.f32 0.25, %v425_v2  ;;  %v434_v5 = vsel %vm433_vm3, %v431_v63, -inf }
 0x2f0   :  { %435 = vmax.xlane.f32.xlu1 %v434_v5  ;;  %v2348_v6 = vpop.f32.mrf.mxu1 }
 0x2f1   :  { %v432_v7 = vadd.f32 %v430_v4, %v2889_v3 }
 0x2f3   :  { %v437_v8 = vsel %vm433_vm3, %v432_v7, -inf }
 0x2f4   :  { %438 = vmax.xlane.f32.xlu0 %v437_v8 }
 0x379   :  { %v436_v9 = vpop.xlane.xlu1 %435 }
 0x37a   :  { %v440_v10 = vsub.f32 %v431_v63, %v436_v9 }
 0x37c   :  { %v442_v11 = vmul.f32 1.442695, %v440_v10 }
 0x37d   :  { %v439_v12 = vpop.xlane.xlu0 %438 }
 0x37e   :  { %2508 = vpow2.f32 %v442_v11  ;;  %v441_v13 = vsub.f32 %v432_v7, %v439_v12 }
 0x380   :  { %v444_v17 = vmul.f32 1.442695, %v441_v13 }
 0x382   :  { %2510 = vpow2.f32 %v444_v17 }
 0x38b   :  { %v2509_v18 = vpop.eup %2508 }
 0x38c   :  { %v446_v19 = vsel %vm433_vm3, %v2509_v18, 0.0 }
 0x38d   :  { %447 = vadd.xlane.f32.xlu0 %v446_v19 }
 0x38f   :  { %v2511_v20 = vpop.eup %2510 }
 0x390   :  { %v449_v21 = vsel %vm433_vm3, %v2511_v20, 0.0 }
 0x391   :  { %450 = vadd.xlane.f32.xlu1 %v449_v21 }
 0x3a2   :  { %534 = vrot.lane.b32.xlu1 %v2850_v41, %s2713_s3 }
 0x3a3   :  { %457 = vrot.lane.b32.xlu0 %v2842_v37, %s2713_s3 }
 0x3a6   :  { %693 = vrot.lane.b32.xlu1 %v2805_v15, %s2703_s12 }
 0x3a7   :  { %695 = vrot.lane.b32.xlu0 %v2807_v16, %s2703_s12 }
 0x416   :  { %v448_v22 = vpop.xlane.xlu0 %447 }
 0x417   :  { %2512 = vrcp.f32 %v448_v22 }
 0x41a   :  { %v458_v23 = vpop.permute.xlu0 %457  ;;  %v451_v25 = vpop.xlane.xlu1 %450 }
 0x41b   :  { %2514 = vrcp.f32 %v451_v25  ;;  %2350 = vmatpush3.msra.mxu1 %v458_v23 }
 0x41c   :  { %2359 = vmatprep.subr.mxu1 %v2926_v48 }
 0x41e   :  { %v2904_v27 = vpop.permute.xlu0 %695  ;;  %v535_v28 = vpop.permute.xlu1 %534 }
 0x41f   :  { %v700_v30 = vmul.f32 %v2904_v27, %v2850_v41  ;;  %2355 = vmatpush3.msra.mxu0 %v535_v28 }
 0x420   :  { %2366 = vmatprep.subr.mxu0 %v2708_v14 }
 0x421   :  { %v704_v31 = vadd.f32 %v702_v29, %v700_v30 }
 0x422   :  { %v2911_v32 = vpop.permute.xlu1 %693 }
 0x423   :  { %v699_v34 = vmul.f32 %v2911_v32, %v2842_v37  ;;  %781 = vrot.lane.b32.xlu0 %v704_v31, %s2711_s10 }
 0x424   :  { %v2513_v39 = vpop.eup %2512 }
 0x425   :  { %v703_v40 = vadd.f32 %v701_v33, %v699_v34  ;;  %v453_v43 = vmul.f32 %v2513_v39, %v2509_v18  ;;  %v2974_v33 = vld [vmem:[#allocation10 + $0x10] sm:$0xff]  ;;  %v1119_v34 = vmul.f32 %v2852_v42, %v2856_v45 }
 0x427   :  { %2352 = vmatmul.mubr.msk.f32.vlgmr.msra.gmra.mxu1 %vm433_vm3, %v453_v43  ;;  %706 = vrot.lane.b32.xlu1 %v703_v40, %s2711_s10 }
 0x428   :  { %v2515_v46 = vpop.eup %2514  ;;  %2360 = vmatpush3.msra.mxu1 %v2926_v48 }
 0x429   :  { %v455_v47 = vmul.f32 %v2515_v46, %v2511_v20  ;;  %2361 = vmatprep.subr.mxu1 %v2930_v49 }
 0x42a   :  { %2362 = vmatpush3.msra.mxu1 %v2930_v49 }
 0x42b   :  { %2357 = vmatmul.mubr.msk.f32.vlgmr.msra.gmra.mxu0 %vm433_vm3, %v455_v47  ;;  %2371 = vmatprep.subr.mxu1 %v2708_v14  ;;  %v1131_v47 = vmul.f32 %v2904_v27, %v2856_v45 }
 0x42c   :  { %2367 = vmatpush3.xpose.msk.msra.mxu0 %vm275_vm2, %v2865_v52  ;;  %2368 = vmatprep.mubr.msk.f32.mxu0 %vm2712_vm1, %v2708_v14 }
 0x42d   :  { %2376 = vmatprep.subr.mxu0 %v2708_v14 }
 0x495   :  { %v782_v55 = vpop.permute.xlu0 %781 }
 0x499   :  { %v707_v50 = vpop.permute.xlu1 %706 }
 0x49a   :  { %2369 = vmatmul.mubr.msk.f32.vlgmr.msra.gmra.mxu0 %vm275_vm2, %v707_v50  ;;  %v1130_v50 = vmul.f32 %v2911_v32, %v2844_v38 }
 0x49b   :  { %2377 = vmatpush3.msra.mxu0 %v458_v23  ;;  %2378 = vmatprep.mubr.msk.f32.mxu0 %vm2712_vm1, %v2708_v14  ;;  %v1118_v23 = vmul.f32 %v2834_v35, %v2844_v38 }
 0x4e7   :  { %v529_v51 = vpop.f32.mrf.mxu1 }
 0x4e8   :  { %2363 = vmatprep.mubr.msk.f32.mxu1 %vm275_vm2, %v529_v51 }
 0x4e9   :  { %v2353_v52 = vpop.f32.mrf.mxu1 }
 0x4eb   :  { %v606_v53 = vpop.f32.mrf.mxu0 }
 0x4ec   :  { %2364 = vmatmul.mubr.msk.f32.vlgmr.msra.gmra.mxu1 %vm275_vm2, %v606_v53 }
 0x4ed   :  { %2372 = vmatpush3.xpose.msk.msra.mxu1 %vm275_vm2, %v2874_v56  ;;  %v2358_v54 = vpop.f32.mrf.mxu0  ;;  %2373 = vmatprep.mubr.msk.f32.mxu1 %vm2712_vm1, %v2708_v14 }
 0x4ee   :  { %2381 = vmatprep.subr.mxu1 %v2708_v14 }
 0x4f0   :  { %2374 = vmatmul.mubr.msk.f32.vlgmr.msra.gmra.mxu1 %vm275_vm2, %v782_v55 }
 0x4f1   :  { %2382 = vmatpush3.msra.mxu1 %v535_v28  ;;  %2383 = vmatprep.mubr.msk.f32.mxu1 %vm2712_vm1, %v2708_v14 }
 0x4f2   :  { %2393 = vmatprep.subr.mxu1 %v2708_v14 }
 0x55a   :  { %v776_v57 = vpop.f32.mrf.mxu0 }
 0x55b   :  { %v855_v58 = vmul.f32 0.25, %v776_v57 }
 0x55c   :  { %v2370_v59 = vpop.f32.mrf.mxu0 }
 0x55d   :  { %v857_v56 = vadd.f32 %v855_v58, %v2886_v60 }
 0x55f   :  { %v859_v61 = vsel %vm433_vm3, %v857_v56, -inf }
 0x560   :  { %860 = vmax.xlane.f32.xlu1 %v859_v61 }
 0x5ac   :  { %v2951_v62 = vpop.f32.mrf.mxu1 }
 0x5ae   :  { %v2953_v63 = vpop.f32.mrf.mxu1 }
 0x5b0   :  { %v851_v2 = vpop.f32.mrf.mxu1 }
 0x5b1   :  { %v856_v4 = vmul.f32 0.25, %v851_v2 }
 0x5b2   :  { %v2375_v5 = vpop.f32.mrf.mxu1 }
 0x5b3   :  { %v858_v6 = vadd.f32 %v856_v4, %v2889_v3 }
 0x5b5   :  { %v862_v7 = vsel %vm433_vm3, %v858_v6, -inf }
 0x5b6   :  { %863 = vmax.xlane.f32.xlu0 %v862_v7 }
 0x5e9   :  { %v861_v8 = vpop.xlane.xlu1 %860 }
 0x5ea   :  { %v865_v9 = vsub.f32 %v857_v56, %v861_v8  ;;  %v692_v8 = vadd.f32 %v2951_v62, %v2793_v1 }
 0x5ec   :  { %v867_v10 = vmul.f32 1.442695, %v865_v9 }
 0x5ee   :  { %2516 = vpow2.f32 %v867_v10  ;;  %v691_v10 = vadd.f32 %v2953_v63, %v2791_v0 }
 0x5fb   :  { %v2517_v11 = vpop.eup %2516 }
 0x5fc   :  { %v871_v12 = vsel %vm433_vm3, %v2517_v11, 0.0 }
 0x5fd   :  { %872 = vadd.xlane.f32.xlu0 %v871_v12 }
 0x613   :  { %1110 = vrot.lane.b32.xlu0 %v2805_v15, %s2714_s14 }
 0x617   :  { %1124 = vrot.lane.b32.xlu0 %v2807_v16, %s2713_s3 }
 0x63f   :  { %v864_v13 = vpop.xlane.xlu0 %863 }
 0x640   :  { %v866_v17 = vsub.f32 %v858_v6, %v864_v13 }
 0x642   :  { %v869_v18 = vmul.f32 1.442695, %v866_v17 }
 0x644   :  { %2518 = vpow2.f32 %v869_v18 }
 0x651   :  { %v2519_v19 = vpop.eup %2518 }
 0x652   :  { %v874_v20 = vsel %vm433_vm3, %v2519_v19, 0.0 }
 0x653   :  { %875 = vadd.xlane.f32.xlu1 %v874_v20 }
 0x664   :  { %1112 = vrot.lane.b32.xlu1 %v2807_v16, %s2714_s14  ;;  %v2972_v16 = vld [vmem:[#allocation10 + $0x18] sm:$0xff] }
 0x665   :  { %2386 = vmatprep.subr.mxu0 %v2972_v16 }
 0x668   :  { %1122 = vrot.lane.b32.xlu1 %v2805_v15, %s2713_s3 }
 0x686   :  { %v873_v21 = vpop.xlane.xlu0 %872 }
 0x687   :  { %2520 = vrcp.f32 %v873_v21 }
 0x68a   :  { %v1111_v22 = vpop.permute.xlu0 %1110 }
 0x68b   :  { %v1116_v25 = vmul.f32 %v1111_v22, %v2842_v37 }
 0x68d   :  { %v1120_v28 = vadd.f32 %v1118_v23, %v1116_v25  ;;  %v1556_v25 = vmul.f32 %v2854_v44, %v2850_v41  ;;  %v1555_v44 = vmul.f32 %v2840_v36, %v2842_v37 }
 0x68e   :  { %v2979_v15 = vpop.permute.xlu0 %1124 }
 0x68f   :  { %1138 = vrot.lane.b32.xlu1 %v1120_v28, %s2710_s6  ;;  %v1129_v40 = vmul.f32 %v2979_v15, %v2850_v41  ;;  %v1558_v63 = vmul.f32 %v2979_v15, %v2856_v45 }
 0x691   :  { %v1133_v42 = vadd.f32 %v1131_v47, %v1129_v40  ;;  %v1560_v28 = vadd.f32 %v1558_v63, %v1556_v25 }
 0x694   :  { %v2521_v29 = vpop.eup %2520 }
 0x695   :  { %v878_v30 = vmul.f32 %v2521_v29, %v2517_v11 }
 0x697   :  { %2379 = vmatmul.mubr.msk.f32.vlgmr.msra.gmra.mxu0 %vm433_vm3, %v878_v30 }
 0x698   :  { %2387 = vmatpush3.msra.mxu0 %v2972_v16 }
 0x699   :  { %2388 = vmatprep.subr.mxu0 %v2974_v33 }
 0x69a   :  { %2389 = vmatpush3.msra.mxu0 %v2974_v33 }
 0x69b   :  { %2398 = vmatprep.subr.mxu0 %v2708_v14 }
 0x6dc   :  { %v876_v31 = vpop.xlane.xlu1 %875 }
 0x6dd   :  { %2522 = vrcp.f32 %v876_v31 }
 0x6e0   :  { %v1113_v35 = vpop.permute.xlu1 %1112 }
 0x6e1   :  { %v1117_v39 = vmul.f32 %v1113_v35, %v2850_v41 }
 0x6e3   :  { %v1121_v43 = vadd.f32 %v1119_v34, %v1117_v39 }
 0x6e4   :  { %v2988_v46 = vpop.permute.xlu1 %1122 }
 0x6e5   :  { %v1128_v51 = vmul.f32 %v2988_v46, %v2842_v37  ;;  %1218 = vrot.lane.b32.xlu0 %v1121_v43, %s2710_s6  ;;  %v1557_v45 = vmul.f32 %v2988_v46, %v2844_v38  ;;  %v3053_v38 = vld [vmem:[#allocation10 + $0x20] sm:$0xff] }
 0x6e7   :  { %v1132_v52 = vadd.f32 %v1130_v50, %v1128_v51  ;;  %v1559_v15 = vadd.f32 %v1557_v45, %v1555_v44  ;;  %v3051_v50 = vld [vmem:[#allocation10 + $0x28] sm:$0xff] }
 0x6e9   :  { %1215 = vrot.lane.b32.xlu0 %v1133_v42, %s2715_s15  ;;  %1135 = vrot.lane.b32.xlu1 %v1132_v52, %s2715_s15 }
 0x6ea   :  { %v2523_v53 = vpop.eup %2522 }
 0x6eb   :  { %v880_v54 = vmul.f32 %v2523_v53, %v2519_v19 }
 0x6ed   :  { %2384 = vmatmul.mubr.msk.f32.vlgmr.msra.gmra.mxu1 %vm433_vm3, %v880_v54 }
 0x6ee   :  { %2395 = vmatprep.mubr.msk.f32.mxu1 %vm2712_vm1, %v2708_v14 }
 0x701   :  { %v3002_v27 = vpop.permute.xlu1 %1138 }
 0x702   :  { %2394 = vmatpush3.xpose.msk.msra.mxu1 %vm275_vm2, %v3002_v27 }
 0x703   :  { %2403 = vmatprep.subr.mxu1 %v2708_v14 }
 0x757   :  { %v950_v32 = vpop.f32.mrf.mxu0  ;;  %v3011_v58 = vpop.permute.xlu0 %1218 }
 0x758   :  { %2390 = vmatprep.mubr.msk.f32.mxu0 %vm275_vm2, %v950_v32 }
 0x759   :  { %v2380_v55 = vpop.f32.mrf.mxu0 }
 0x75b   :  { %v1136_v57 = vpop.permute.xlu1 %1135  ;;  %v1216_v61 = vpop.permute.xlu0 %1215 }
 0x75c   :  { %2396 = vmatmul.mubr.msk.f32.vlgmr.msra.gmra.mxu1 %vm275_vm2, %v1136_v57 }
 0x75d   :  { %2405 = vmatprep.mubr.msk.f32.mxu1 %vm2712_vm1, %v2708_v14 }
 0x7ad   :  { %v1023_v59 = vpop.f32.mrf.mxu1 }
 0x7ae   :  { %2391 = vmatmul.mubr.msk.f32.vlgmr.msra.gmra.mxu0 %vm275_vm2, %v1023_v59 }
 0x7af   :  { %2399 = vmatpush3.xpose.msk.msra.mxu0 %vm275_vm2, %v3011_v58  ;;  %v2385_v56 = vpop.f32.mrf.mxu1  ;;  %2400 = vmatprep.mubr.msk.f32.mxu0 %vm2712_vm1, %v2708_v14 }
 0x7b0   :  { %2408 = vmatprep.subr.mxu0 %v2708_v14 }
 0x7b2   :  { %2401 = vmatmul.mubr.msk.f32.vlgmr.msra.gmra.mxu0 %vm275_vm2, %v1216_v61 }
 0x7b3   :  { %2410 = vmatprep.mubr.msk.f32.mxu0 %vm2712_vm1, %v2708_v14 }
 0x81c   :  { %v1210_v2 = vpop.f32.mrf.mxu1 }
 0x81d   :  { %v1294_v4 = vmul.f32 0.25, %v1210_v2 }
 0x81e   :  { %v2397_v5 = vpop.f32.mrf.mxu1 }
 0x81f   :  { %v1296_v6 = vadd.f32 %v1294_v4, %v2886_v60 }
 0x821   :  { %v1298_v7 = vsel %vm433_vm3, %v1296_v6, -inf }
 0x822   :  { %1299 = vmax.xlane.f32.xlu1 %v1298_v7 }
 0x86e   :  { %v2392_v9 = vpop.f32.mrf.mxu0 }
 0x86f   :  { %v3028_v11 = vadd.f32 %v2392_v9, %v692_v8 }
 0x870   :  { %v1099_v12 = vpop.f32.mrf.mxu0 }
 0x871   :  { %v3030_v13 = vadd.f32 %v1099_v12, %v691_v10 }
 0x872   :  { %v1290_v17 = vpop.f32.mrf.mxu0 }
 0x873   :  { %v1295_v18 = vmul.f32 0.25, %v1290_v17 }
 0x874   :  { %v2402_v19 = vpop.f32.mrf.mxu0 }
 0x875   :  { %v1297_v20 = vadd.f32 %v1295_v18, %v2889_v3 }
 0x877   :  { %v1301_v21 = vsel %vm433_vm3, %v1297_v20, -inf }
 0x878   :  { %1302 = vmax.xlane.f32.xlu0 %v1301_v21 }
 0x8ab   :  { %v1300_v22 = vpop.xlane.xlu1 %1299 }
 0x8ac   :  { %v1304_v23 = vsub.f32 %v1296_v6, %v1300_v22 }
 0x8ae   :  { %v1306_v1 = vmul.f32 1.442695, %v1304_v23 }
 0x8b0   :  { %2524 = vpow2.f32 %v1306_v1  ;;  %v238_v1 = vld [vmem:[#allocation10 + $0x30] sm:$0xff] }
 0x8bd   :  { %v2525_v62 = vpop.eup %2524 }
 0x8be   :  { %v1310_v0 = vsel %vm433_vm3, %v2525_v62, 0.0 }
 0x8bf   :  { %1311 = vadd.xlane.f32.xlu0 %v1310_v0 }
 0x8d5   :  { %1320 = vrot.lane.b32.xlu0 %v2842_v37, %s2703_s12 }
 0x8d9   :  { %1637 = vrot.lane.b32.xlu0 %v1560_v28, %s2714_s14 }
 0x901   :  { %v1303_v29 = vpop.xlane.xlu0 %1302 }
 0x902   :  { %v1305_v30 = vsub.f32 %v1297_v20, %v1303_v29 }
 0x904   :  { %v1308_v31 = vmul.f32 1.442695, %v1305_v30 }
 0x906   :  { %2526 = vpow2.f32 %v1308_v31 }
 0x913   :  { %v2527_v35 = vpop.eup %2526 }
 0x914   :  { %v1313_v34 = vsel %vm433_vm3, %v2527_v35, 0.0 }
 0x915   :  { %1314 = vadd.xlane.f32.xlu1 %v1313_v34 }
 0x926   :  { %1396 = vrot.lane.b32.xlu1 %v2850_v41, %s2703_s12  ;;  %s2716_s12 = smov [#allocation13]  }
 0x927   :  { %s2222_s16 = sshll.u32 %s2716_s12, 4  ;;  %s2223_s16 = int_to_ptr.vmem [resolvable:$true] %s2222_s16 }
 0x928   :  { %s2668_s17 = scalar_lea.vmem %s2223_s16, 256  ;;  %p2673_p3 = scmp.lt.s32.totalorder %s2223_s16, %s2223_s16 }
 0x929   :  { %p2669_p2 = scmp.ne.s32.totalorder %s2223_s16, %s2668_s17  ;;  %p2674_p4 = scmp.lt.s32.totalorder %s2668_s17, %s2668_s17 }
 0x92a   :  { %1562 = vrot.lane.b32.xlu1 %v1559_v15, %s2714_s14 }
 0x92b   :  { %p2675_p5 = por %p2674_p4, %p2673_p3 }
 0x92d   :  { %p2676_p6 = pnand %p2675_p5, %p2669_p2 }
 0x948   :  { %v1312_v39 = vpop.xlane.xlu0 %1311 }
 0x949   :  { %2528 = vrcp.f32 %v1312_v39 }
 0x94c   :  { %v1321_v40 = vpop.permute.xlu0 %1320 }
 0x94d   :  { %2404 = vmatpush3.msra.mxu1 %v1321_v40 }
 0x94e   :  { %2413 = vmatprep.subr.mxu1 %v3051_v50 }
 0x956   :  { %v2529_v43 = vpop.eup %2528 }
 0x957   :  { %v1317_v47 = vmul.f32 %v2529_v43, %v2525_v62  ;;  %v1991_v43 = vld [vmem:[#allocation11 + $0x18] sm:$0xff] }
 0x959   :  { %2406 = vmatmul.mubr.msk.f32.vlgmr.msra.gmra.mxu1 %vm433_vm3, %v1317_v47  ;;  %v1990_v47 = vld [vmem:[#allocation11 + $0x10] sm:$0xff] }
 0x95a   :  { %2414 = vmatpush3.msra.mxu1 %v3051_v50 }
 0x95b   :  { %2415 = vmatprep.subr.mxu1 %v3053_v38 }
 0x95c   :  { %2416 = vmatpush3.msra.mxu1 %v3053_v38 }
 0x95d   :  { %2425 = vmatprep.subr.mxu1 %v2708_v14 }
 0x99e   :  { %v1315_v36 = vpop.xlane.xlu1 %1314 }
 0x99f   :  { %2530 = vrcp.f32 %v1315_v36  ;;  %v1989_v36 = vld [vmem:[#allocation11 + $0x8] sm:$0xff] }
 0x9a2   :  { %v1397_v37 = vpop.permute.xlu1 %1396 }
 0x9a3   :  { %2409 = vmatpush3.msra.mxu0 %v1397_v37 }
 0x9a4   :  { %2420 = vmatprep.subr.mxu0 %v2708_v14 }
 0x9a6   :  { %v1563_v51 = vpop.permute.xlu1 %1562 }
 0x9ac   :  { %v2531_v41 = vpop.eup %2530 }
 0x9ad   :  { %v1319_v46 = vmul.f32 %v2531_v41, %v2527_v35 }
 0x9af   :  { %2411 = vmatmul.mubr.msk.f32.vlgmr.msra.gmra.mxu0 %vm433_vm3, %v1319_v46 }
 0x9b0   :  { %2421 = vmatpush3.xpose.msk.msra.mxu0 %vm275_vm2, %v3002_v27  ;;  %2422 = vmatprep.mubr.msk.f32.mxu0 %vm2712_vm1, %v2708_v14  ;;  %v1638_v27 = vpop.permute.xlu0 %1637 }
 0x9b1   :  { %2430 = vmatprep.subr.mxu0 %v2708_v14 }
 0x9b3   :  { %2423 = vmatmul.mubr.msk.f32.vlgmr.msra.gmra.mxu0 %vm275_vm2, %v1563_v51 }
 0x9b4   :  { %2431 = vmatpush3.msra.mxu0 %v1321_v40  ;;  %2432 = vmatprep.mubr.msk.f32.mxu0 %vm2712_vm1, %v2708_v14 }
 0xa19   :  { %v1392_v42 = vpop.f32.mrf.mxu1 }
 0xa1a   :  { %2417 = vmatprep.mubr.msk.f32.mxu1 %vm275_vm2, %v1392_v42 }
 0xa1b   :  { %v2407_v52 = vpop.f32.mrf.mxu1 }
 0xa6f   :  { %v1468_v53 = vpop.f32.mrf.mxu0 }
 0xa70   :  { %2418 = vmatmul.mubr.msk.f32.vlgmr.msra.gmra.mxu1 %vm275_vm2, %v1468_v53  ;;  %v1984_v53 = vsub.s32 1, %v2821_v24 }
 0xa71   :  { %2426 = vmatpush3.xpose.msk.msra.mxu1 %vm275_vm2, %v3011_v58  ;;  %v2412_v54 = vpop.f32.mrf.mxu0  ;;  %2427 = vmatprep.mubr.msk.f32.mxu1 %vm2712_vm1, %v2708_v14 }
 0xa72   :  { %2435 = vmatprep.subr.mxu1 %v2708_v14 }
 0xa73   :  { %v1632_v32 = vpop.f32.mrf.mxu0 }
 0xa74   :  { %v1711_v55 = vmul.f32 0.25, %v1632_v32  ;;  %2428 = vmatmul.mubr.msk.f32.vlgmr.msra.gmra.mxu1 %vm275_vm2, %v1638_v27  ;;  %v1985_v27 = vrot.slane %v2826_v26, %v1984_v53 }
 0xa75   :  { %2436 = vmatpush3.msra.mxu1 %v1397_v37  ;;  %v2424_v57 = vpop.f32.mrf.mxu0  ;;  %2437 = vmatprep.mubr.msk.f32.mxu1 %vm2712_vm1, %v2708_v14  ;;  %v1988_v37 = vld [vmem:[#allocation11] sm:$0xff] }
 0xa76   :  { %v1713_v59 = vadd.f32 %v1711_v55, %v2886_v60  ;;  %2447 = vmatprep.subr.mxu1 %v1991_v43 }
 0xa78   :  { %v1715_v58 = vsel %vm433_vm3, %v1713_v59, -inf }
 0xa79   :  { %1716 = vmax.xlane.f32.xlu1 %v1715_v58 }
 0xb02   :  { %v1717_v56 = vpop.xlane.xlu1 %1716 }
 0xb03   :  { %v1721_v61 = vsub.f32 %v1713_v59, %v1717_v56 }
 0xb05   :  { %v1723_v2 = vmul.f32 1.442695, %v1721_v61 }
 0xb07   :  { %2532 = vpow2.f32 %v1723_v2 }
 0xb14   :  { %v2533_v12 = vpop.eup %2532 }
 0xb15   :  { %v1727_v17 = vsel %vm433_vm3, %v2533_v12, 0.0 }
 0xb30   :  { %v2419_v4 = vpop.f32.mrf.mxu1 }
 0xb31   :  { %v1554_v5 = vadd.f32 %v2419_v4, %v3028_v11 }
 0xb32   :  { %v1544_v6 = vpop.f32.mrf.mxu1 }
 0xb33   :  { %v1553_v7 = vadd.f32 %v1544_v6, %v3030_v13 }
 0xb34   :  { %v1707_v8 = vpop.f32.mrf.mxu1 }
 0xb35   :  { %v1712_v9 = vmul.f32 0.25, %v1707_v8 }
 0xb36   :  { %v2429_v10 = vpop.f32.mrf.mxu1 }
 0xb37   :  { %v1714_v14 = vadd.f32 %v1712_v9, %v2889_v3  ;;  %v239_v3 = vld [vmem:[#allocation10 + $0x38] sm:$0xff] }
 0xb38   :  { %2440 = vmatprep.subr.mxu0 %v239_v3 }
 0xb39   :  { %v1718_v60 = vsel %vm433_vm3, %v1714_v14, -inf }
 0xb3a   :  { %1719 = vmax.xlane.f32.xlu0 %v1718_v60 }
 0xb3e   :  { %1728 = vadd.xlane.f32.xlu0 %v1727_v17 }
 0xbc3   :  { %v1720_v18 = vpop.xlane.xlu0 %1719 }
 0xbc4   :  { %v1722_v19 = vsub.f32 %v1714_v14, %v1720_v18 }
 0xbc6   :  { %v1725_v20 = vmul.f32 1.442695, %v1722_v19 }
 0xbc7   :  { %v1729_v21 = vpop.xlane.xlu0 %1728 }
 0xbc8   :  { %2534 = vpow2.f32 %v1725_v20 }
 0xbc9   :  { %2536 = vrcp.f32 %v1729_v21 }
 0xbd5   :  { %v2535_v11 = vpop.eup %2534 }
 0xbd6   :  { %v2537_v13 = vpop.eup %2536  ;;  %v1730_v22 = vsel %vm433_vm3, %v2535_v11, 0.0 }
 0xbd7   :  { %1731 = vadd.xlane.f32.xlu1 %v1730_v22  ;;  %v1734_v23 = vmul.f32 %v2537_v13, %v2533_v12 }
 0xbd9   :  { %2433 = vmatmul.mubr.msk.f32.vlgmr.msra.gmra.mxu0 %vm433_vm3, %v1734_v23 }
 0xbda   :  { %2441 = vmatpush3.msra.mxu0 %v239_v3 }
 0xbdb   :  { %2442 = vmatprep.subr.mxu0 %v238_v1 }
 0xbdc   :  { %2443 = vmatpush3.msra.mxu0 %v238_v1 }
 0xc60   :  { %v1732_v62 = vpop.xlane.xlu1 %1731 }
 0xc61   :  { %2538 = vrcp.f32 %v1732_v62 }
 0xc6e   :  { %v2539_v0 = vpop.eup %2538 }
 0xc6f   :  { %v1736_v63 = vmul.f32 %v2539_v0, %v2535_v11 }
 0xc71   :  { %2438 = vmatmul.mubr.msk.f32.vlgmr.msra.gmra.mxu1 %vm433_vm3, %v1736_v63 }
 0xc72   :  { %2448 = vmatpush3.msra.mxu1 %v1991_v43 }
 0xc73   :  { %2449 = vmatprep.subr.mxu1 %v1990_v47 }
 0xc74   :  { %2450 = vmatpush3.msra.mxu1 %v1990_v47 }
 0xc75   :  { %2451 = vmatprep.subr.mxu1 %v1989_v36 }
 0xc76   :  { %2452 = vmatpush3.msra.mxu1 %v1989_v36 }
 0xc77   :  { %2453 = vmatprep.subr.mxu1 %v1988_v37 }
 0xc78   :  { %2454 = vmatpush3.msra.mxu1 %v1988_v37 }
 0xc99   :  { %v1806_v25 = vpop.f32.mrf.mxu0 }
 0xc9a   :  { %2444 = vmatprep.mubr.msk.f32.mxu0 %vm275_vm2, %v1806_v25 }
 0xc9b   :  { %v2434_v28 = vpop.f32.mrf.mxu0 }
 0xd31   :  { %v1879_v29 = vpop.f32.mrf.mxu1 }
 0xd32   :  { %2445 = vmatmul.mubr.msk.f32.vlgmr.msra.gmra.mxu0 %vm275_vm2, %v1879_v29 }
 0xd33   :  { %v2439_v30 = vpop.f32.mrf.mxu1 }
 0xdf2   :  { %v2446_v31 = vpop.f32.mrf.mxu0 }
 0xdf3   :  { %v3092_v35 = vadd.f32 %v2446_v31, %v1554_v5 }
 0xdf4   :  { %v1955_v34 = vpop.f32.mrf.mxu0 }
 0xdf5   :  { %v3094_v45 = vadd.f32 %v1955_v34, %v1553_v7  ;;  %v1967_v44 = vmul.f32 %v3092_v35, %v3092_v35 }
 0xdf7   :  { %v1971_v15 = vsel %vm114_vm0, %v1967_v44, 0.0  ;;  %v1966_v39 = vmul.f32 %v3094_v45, %v3094_v45 }
 0xdf8   :  { %1972 = vadd.xlane.f32.xlu1 %v1971_v15 }
 0xdf9   :  { %v1968_v40 = vsel %vm114_vm0, %v1966_v39, 0.0 }
 0xdfa   :  { %1969 = vadd.xlane.f32.xlu0 %v1968_v40 }
 0xe09   :  { %2121 = vrot.lane.b32.xlu1 %v238_v1, %s2715_s15 }
 0xe0d   :  { %2119 = vrot.lane.b32.xlu1 %v3051_v50, %s2715_s15 }
 0xe10   :  { %2123 = vrot.lane.b32.xlu0 %v239_v3, %s2715_s15 }
 0xe11   :  { %2115 = vrot.lane.b32.xlu1 %v2972_v16, %s2715_s15 }
 0xe14   :  { %2117 = vrot.lane.b32.xlu0 %v3053_v38, %s2715_s15 }
 0xe15   :  { %2111 = vrot.lane.b32.xlu1 %v2926_v48, %s2715_s15 }
 0xe18   :  { %2113 = vrot.lane.b32.xlu0 %v2974_v33, %s2715_s15 }
 0xe81   :  { %v1973_v41 = vpop.xlane.xlu1 %1972 }
 0xe82   :  { %v1975_v46 = vmul.f32 0.03125, %v1973_v41 }
 0xe83   :  { %v1970_v50 = vpop.xlane.xlu0 %1969 }
 0xe84   :  { %v1977_v51 = vadd.f32 1e-06, %v1975_v46  ;;  %v1974_v42 = vmul.f32 0.03125, %v1970_v50 }
 0xe85   :  { %v2122_v55 = vpop.permute.xlu1 %2121 }
 0xe86   :  { %2540 = vrsqrt.f32 %v1977_v51  ;;  %v1976_v52 = vadd.f32 1e-06, %v1974_v42 }
 0xe87   :  { %v2124_v57 = vpop.permute.xlu0 %2123 }
 0xe88   :  { %2542 = vrsqrt.f32 %v1976_v52  ;;  %2458 = vmatprep.subr.mxu0 %v2124_v57 }
 0xe89   :  { %2459 = vmatpush3.msra.mxu0 %v2124_v57  ;;  %v2120_v24 = vpop.permute.xlu1 %2119 }
 0xe8a   :  { %2460 = vmatprep.subr.mxu0 %v2122_v55 }
 0xe8b   :  { %2461 = vmatpush3.msra.mxu0 %v2122_v55  ;;  %v2118_v59 = vpop.permute.xlu0 %2117 }
 0xe8c   :  { %2462 = vmatprep.subr.mxu0 %v2120_v24 }
 0xe8d   :  { %2463 = vmatpush3.msra.mxu0 %v2120_v24  ;;  %v2116_v26 = vpop.permute.xlu1 %2115 }
 0xe8e   :  { %2464 = vmatprep.subr.mxu0 %v2118_v59 }
 0xe8f   :  { %2465 = vmatpush3.msra.mxu0 %v2118_v59  ;;  %v2114_v58 = vpop.permute.xlu0 %2113 }
 0xe90   :  { %2466 = vmatprep.subr.mxu0 %v2116_v26 }
 0xe91   :  { %2467 = vmatpush3.msra.mxu0 %v2116_v26  ;;  %v2112_v56 = vpop.permute.xlu1 %2111 }
 0xe92   :  { %2468 = vmatprep.subr.mxu0 %v2114_v58 }
 0xe93   :  { %v2541_v16 = vpop.eup %2540  ;;  %2469 = vmatpush3.msra.mxu0 %v2114_v58 }
 0xe94   :  { %v1981_v38 = vmul.f32 %v2541_v16, %v3092_v35  ;;  %2470 = vmatprep.subr.mxu0 %v2112_v56 }
 0xe95   :  { %v2543_v54 = vpop.eup %2542  ;;  %2471 = vmatpush3.msra.mxu0 %v2112_v56 }
 0xe96   :  { %v1980_v48 = vmul.f32 %v2543_v54, %v3094_v45  ;;  %v1987_v33 = vmul.f32 %v1985_v27, %v1981_v38 }
 0xe98   :  { %v1986_v32 = vmul.f32 %v1985_v27, %v1980_v48 }
 0xe9a   :  { %2455 = vmatprep.mubr.msk.f32.mxu1 %vm114_vm0, %v1986_v32 }
 0xe9b   :  { %2456 = vmatmul.mubr.msk.f32.vlgmr.msra.gmra.mxu1 %vm114_vm0, %v1987_v33 }
 0xf5b   :  { %v2457_v61 = vpop.f32.mrf.mxu1 }
 0xf5c   :  { %2095 = vrot.lane.b32.xlu1 %v2457_v61, %s2709_s5  ;;  %v2074_v5 = vmul.f32 %v2457_v61, %v2457_v61 }
 0xf5d   :  { %v2064_v2 = vpop.f32.mrf.mxu1 }
 0xf5e   :  { %2093 = vrot.lane.b32.xlu0 %v2064_v2, %s2709_s5  ;;  %v2073_v4 = vmul.f32 %v2064_v2, %v2064_v2  ;;  %v2076_v7 = vmul.f32 %v2457_v61, %v2074_v5 }
 0xf60   :  { %v2075_v6 = vmul.f32 %v2073_v4, %v2064_v2  ;;  %v2078_v9 = vmul.f32 0.044715, %v2076_v7 }
 0xf62   :  { %2109 = vrot.lane.b32.xlu0 %v2930_v49, %s2715_s15  ;;  %v2077_v8 = vmul.f32 0.044715, %v2075_v6  ;;  %v2080_v14 = vadd.f32 %v2457_v61, %v2078_v9 }
 0xf64   :  { %v2079_v10 = vadd.f32 %v2077_v8, %v2064_v2  ;;  %v2082_v12 = vmul.f32 0.7978846, %v2080_v14 }
 0xf66   :  { %v2081_v60 = vmul.f32 0.7978846, %v2079_v10 }
 0xf68   :  { %2544 = vtanh.f32 %v2081_v60 }
 0xf69   :  { %2546 = vtanh.f32 %v2082_v12 }
 0xf75   :  { %v2545_v17 = vpop.eup %2544 }
 0xf76   :  { %v2085_v18 = vadd.f32 1.0, %v2545_v17  ;;  %v2547_v19 = vpop.eup %2546 }
 0xf77   :  { %v2086_v20 = vadd.f32 1.0, %v2547_v19 }
 0xf78   :  { %v2087_v21 = vmul.f32 0.5, %v2085_v18 }
 0xf79   :  { %v2088_v11 = vmul.f32 0.5, %v2086_v20 }
 0xf7a   :  { %v2089_v13 = vmul.f32 %v2087_v21, %v2064_v2 }
 0xf7b   :  { %v2090_v3 = vmul.f32 %v2457_v61, %v2088_v11 }
 0xfce   :  { %v2096_v23 = vpop.permute.xlu1 %2095 }
 0xfcf   :  { %v2100_v62 = vmul.f32 %v2096_v23, %v2090_v3 }
 0xfd0   :  { %v2094_v49 = vpop.permute.xlu0 %2093 }
 0xfd1   :  { %v2099_v22 = vmul.f32 %v2094_v49, %v2089_v13 }
 0xfd3   :  { %2474 = vmatprep.mubr.msk.f32.mxu0 %vm2133_vm4, %v2099_v22 }
 0xfd4   :  { %v2110_v1 = vpop.permute.xlu0 %2109 }
 0xfd5   :  { %2472 = vmatprep.subr.mxu0 %v2110_v1 }
 0xfd6   :  { %2473 = vmatpush3.msra.mxu0 %v2110_v1 }
 0xfd7   :  { %2475 = vmatmul.mubr.msk.f32.vlgmr.msra.gmra.mxu0 %vm2133_vm4, %v2100_v62 }
0x1097   :  { %v2476_v0 = vpop.f32.mrf.mxu0 }
0x1098   :  { %v2212_v63 = vadd.f32 %v2476_v0, %v3092_v35 }
0x1099   :  { %v2206_v25 = vpop.f32.mrf.mxu0 }
0x109a   :  { %2216 = vst.msk [vmem:[#allocation13 + $0x8] sm:$0xff] %vm114_vm0, %v2212_v63  ;;  %v2207_v28 = vadd.f32 %v2206_v25, %v3094_v45 }
0x109c   :  { %2215 = vst.msk [vmem:[#allocation13] sm:$0xff] %vm114_vm0, %v2207_v28 }
0x109d   :  { %2679 = shalt.err (!%p2676_p6)
}
0x109e   :  { %2228 = dma.vmem_to_hbm [thread:$0]  %s2223_s16, 256, %s3141_s7, [#allocation4], %s2700_s29, %s2700_s29, %s2701_s30  }
0x109f   :  { %2696 = dma.done.wait [#allocation4], 256  }
0x10a0   :  { %2697 = vsyncadd [#allocation4], 4294967040 }
0x10a1   :  { %2232 = vsyncpa [#allocation3], 1 }
0x10a2   :  { %2233 = vsyncpa [#allocation6], 1 }
0x10a3   :  { %2234 = vsyncpa [#allocation9], 1 }
0x10a4   :  { %2235 = vsyncpa [#allocation12], 1 }
0x10a5   :  { %2236 = vsyncpa [#allocation4], 1 }

</bundles_post_ra>
